<compile_context>
chip_gen: v7x
topology: tpu7x:2x2x1
jax: 0.10.0
libtpu: 0.0.40
codegen_flags: <defaults>
</compile_context>

<pallas_src>
import numpy as np
import jax
import jax.numpy as jnp
from jax import lax
from jax.experimental import pallas as pl
from jax.experimental.pallas import tpu as pltpu

BBOX_W, MASK_W, BOUND_W = 0.4, 0.4, 0.2

# Streaming block target (~4 MiB is safe on every generation incl. v7x's
# 64 MiB VMEM) and inner strip-mine chunk target (~256 KiB keeps the ~8-10
# f32 elementwise temporaries comfortably inside VMEM / out of spill land).
_TARGET_BLOCK_BYTES = 4 << 20
_TARGET_CHUNK_BYTES = 256 << 10


def _cdiv(a, b):
    return -(-a // b)


def _round_down(x, m):
    return (x // m) * m


# ---------------------------------------------------------------------------
# Polynomial softplus: log(1 + exp(-x)) for x in [0, 2].
# pg = |dx| + |dy| of values in [0, 1] is provably in [0, 2], so a degree-10
# least-squares fit (max error ~1e-8) replaces two EUP transcendentals
# (exp + log) per element with pure-VALU FMAs.
# ---------------------------------------------------------------------------
def _softplus_neg_coeffs(deg=10):
    x = np.linspace(0.0, 2.0, 8193)
    y = np.log1p(np.exp(-x))
    return tuple(float(c) for c in np.polyfit(x - 1.0, y, deg))  # high -> low


_SOFTPLUS_COEFFS = _softplus_neg_coeffs()


def _softplus_neg(pg):
    t = pg - 1.0
    r = _SOFTPLUS_COEFFS[0] * t + _SOFTPLUS_COEFFS[1]
    for c in _SOFTPLUS_COEFFS[2:]:
        r = r * t + c
    return r


def _elem_loss(pm, tm, kx, ky, shift_x, shift_y):
    """Weighted per-element mask-BCE + boundary BCE-with-logits."""
    # nn.BCELoss elementwise (PyTorch clamps the log terms at -100).
    log_p = jnp.maximum(jnp.log(pm), -100.0)
    log_q = jnp.maximum(jnp.log(1.0 - pm), -100.0)
    bce = -(tm * log_p + (1.0 - tm) * log_q)

    # Forward finite-difference boundary map |dx| + |dy|; wrap-around entries
    # of the shifts are zeroed by the kx / ky edge masks.
    def grad(m):
        return jnp.abs(shift_x(m) - m) * kx + jnp.abs(shift_y(m) - m) * ky

    pg = grad(pm)                    # logits, >= 0 (max(pg,0)==pg, |pg|==pg)
    tg = grad(tm)
    bnd = pg - pg * tg + _softplus_neg(pg)  # nn.BCEWithLogitsLoss elementwise
    return MASK_W * bce + BOUND_W * bnd


# ---------------------------------------------------------------------------
# Kernels
# ---------------------------------------------------------------------------
def _make_flat_kernel(tn, cr, w, hw, n_rows, needs_row_mask, out_rows):
    """W < 128: one folded mask per row of a lane-dense (tn, H*W) block."""
    n_chunks = tn // cr
    shift_x = lambda m: jnp.roll(m, -1, axis=1)   # value at (h, w+1)
    shift_y = lambda m: jnp.roll(m, -w, axis=1)   # value at (h+1, w)

    def kernel(pm_ref, tm_ref, kx_ref, ky_ref, out_ref):
        kx = kx_ref[...]                          # (1, HW): broadcasts in mults
        ky = ky_ref[...]
        base = pl.program_id(0) * tn

        def chunk(c, acc):
            off = c * cr
            if not isinstance(off, int):
                off = pl.multiple_of(off, cr)
            pm = pm_ref[pl.ds(off, cr), :].astype(jnp.float32)
            tm = tm_ref[pl.ds(off, cr), :].astype(jnp.float32)
            elem = _elem_loss(pm, tm, kx, ky, shift_x, shift_y)
            if needs_row_mask:
                # True select: NaN/Inf from garbage tail rows never reach the
                # sum (do NOT rewrite this as a multiply-by-mask).
                row = lax.broadcasted_iota(jnp.int32, elem.shape, 0)
                elem = jnp.where(base + off + row < n_rows, elem, 0.0)
            return acc + elem

        init = jnp.zeros((cr, hw), jnp.float32)
        if n_chunks == 1:
            acc = chunk(0, init)
        else:
            acc = lax.fori_loop(0, n_chunks, chunk, init,
                                unroll=n_chunks <= 8)
        if out_rows != cr:        # fold sublane groups via elementwise adds
            acc = acc.reshape(cr // 8, 8, hw).sum(axis=0)
        out_ref[...] = acc.reshape(1, out_rows, hw)

    return kernel


def _make_planar_kernel(tn, cm, h, w, n_rows, needs_row_mask, out_rows):
    """W >= 128: (tn, H, W) blocks; y-neighbour = sublane shift,
    x-neighbour = lane rotate by 1; edge masks built in-kernel."""
    n_chunks = tn // cm
    shift_x = lambda m: jnp.roll(m, -1, axis=2)
    shift_y = lambda m: jnp.roll(m, -1, axis=1)

    def kernel(pm_ref, tm_ref, out_ref):
        # Edge masks from iota compares (a handful of VALU ops, no resident
        # f32 edge vectors DMA'd / pinned in VMEM); hoisted out of the loop.
        col = lax.broadcasted_iota(jnp.int32, (1, h, w), 2)
        row = lax.broadcasted_iota(jnp.int32, (1, h, w), 1)
        kx = (col < (w - 1)).astype(jnp.float32)
        ky = (row < (h - 1)).astype(jnp.float32)
        base = pl.program_id(0) * tn

        def chunk(c, acc):
            off = c * cm
            if not isinstance(off, int):
                off = pl.multiple_of(off, cm)
            pm = pm_ref[pl.ds(off, cm), :, :].astype(jnp.float32)
            tm = tm_ref[pl.ds(off, cm), :, :].astype(jnp.float32)
            elem = _elem_loss(pm, tm, kx, ky, shift_x, shift_y)
            if needs_row_mask:
                idx = lax.broadcasted_iota(jnp.int32, elem.shape, 0)
                elem = jnp.where(base + off + idx < n_rows, elem, 0.0)
            return acc + elem

        init = jnp.zeros((cm, h, w), jnp.float32)
        if n_chunks == 1:
            acc = chunk(0, init)
        else:
            acc = lax.fori_loop(0, n_chunks, chunk, init,
                                unroll=n_chunks <= 8)
        part = jnp.sum(acc, axis=0)               # elementwise adds over masks
        if out_rows != h:                         # fold H rows in groups of 8
            part = part.reshape(h // 8, 8, w).sum(axis=0)
        out_ref[...] = part.reshape(1, out_rows, w)

    return kernel


# ---------------------------------------------------------------------------
# Tiling
# ---------------------------------------------------------------------------
def _flat_tiling(n, hw, itemsize, block_rows=None):
    """Rows per grid block (tn) and per inner chunk (cr) for W < 128."""
    if n < 8:
        return n, n                      # block sublane dim == full dim
    row_bytes = hw * itemsize
    cr = max(8, _round_down(_TARGET_CHUNK_BYTES // row_bytes, 8))
    cr = min(cr, _round_down(n, 8))
    if n >= 16:                          # leave room for >= 2 grid steps
        cr = min(cr, max(8, _round_down(n // 2, 8)))
    if block_rows is not None:
        tn = max(8, min(_round_down(block_rows, 8), _cdiv(n, 8) * 8))
        cr = min(cr, tn)
        while tn % cr:
            cr -= 8
        return tn, cr
    tn = cr * max(1, _TARGET_BLOCK_BYTES // (cr * row_bytes))
    tn = min(tn, _cdiv(n, cr) * cr)      # never larger than the data
    if n > cr:                           # keep >= 2 grid steps (megacore)
        tn = min(tn, cr * max(1, _cdiv(_cdiv(n, cr), 2)))
    return tn, cr


def _planar_tiling(n, h, w, itemsize, block_rows=None):
    """Masks per grid block (tn) and per inner chunk (cm) for W >= 128."""
    mask_bytes = h * w * itemsize
    cm = max(1, min(_TARGET_CHUNK_BYTES // mask_bytes, n))
    if n >= 2:                           # leave room for >= 2 grid steps
        cm = min(cm, max(1, n // 2))
    if block_rows is not None:
        tn = max(1, min(block_rows, n))
        cm = min(cm, tn)
        while tn % cm:
            cm -= 1
        return tn, cm
    tn = cm * max(1, _TARGET_BLOCK_BYTES // (cm * mask_bytes))
    tn = min(tn, _cdiv(n, cm) * cm)
    if n > cm:
        tn = min(tn, cm * max(1, _cdiv(_cdiv(n, cm), 2)))
    return tn, cm


# ---------------------------------------------------------------------------
# Wrapper
# ---------------------------------------------------------------------------
def hybrid_loss(pred_bbox, pred_mask, target_bbox, target_mask, *,
                block_rows=None):
    """0.4*L1(bbox) + 0.4*BCE(mask) + 0.2*BCEWithLogits(spatial gradients).

    Masks may be passed as bfloat16 to halve HBM traffic on memory-bound
    v5e/v6e (the kernel upcasts to f32); keep f32 for bit-level parity with
    the PyTorch reference.
    """
    # TODO(synk): HybridLoss.compute_gradients() is not shown in the source
    # module; we assume the standard forward finite-difference boundary map
    # |dx| + |dy| with zeros at the last column / row.
    B, C, H, W = pred_mask.shape
    N, HW = B * C, H * W
    itemsize = pred_mask.dtype.itemsize

    if W >= 128:
        # Sublane-oriented layout: y-neighbour is a sublane shift, not a
        # multi-vreg lane rotate by -W on a flattened axis.
        tn, cm = _planar_tiling(N, H, W, itemsize, block_rows)
        out_rows = 8 if H % 8 == 0 else H
        kernel = _make_planar_kernel(tn, cm, H, W, N, (N % tn) != 0, out_rows)
        inputs = (pred_mask.reshape(N, H, W), target_mask.reshape(N, H, W))
        in_specs = [pl.BlockSpec((tn, H, W), lambda i: (i, 0, 0)),
                    pl.BlockSpec((tn, H, W), lambda i: (i, 0, 0))]
        out_cols = W
        chunk_bytes = cm * H * W * 4
        block_bytes = tn * H * W * itemsize
    else:
        # Lane-dense fold: (B, C, H, W) -> (B*C, H*W); one mask per row.
        tn, cr = _flat_tiling(N, HW, itemsize, block_rows)
        out_rows = 8 if cr >= 8 else cr
        kernel = _make_flat_kernel(tn, cr, W, HW, N, (N % tn) != 0, out_rows)
        # Tiny edge masks (shared by pred & target, constant block index ->
        # fetched once).  In-kernel generation would need a vector modulo.
        j = jnp.arange(HW, dtype=jnp.int32)
        kx = ((j % W) != (W - 1)).astype(jnp.float32).reshape(1, HW)
        ky = (j < (H - 1) * W).astype(jnp.float32).reshape(1, HW)
        inputs = (pred_mask.reshape(N, HW), target_mask.reshape(N, HW), kx, ky)
        in_specs = [pl.BlockSpec((tn, HW), lambda i: (i, 0)),
                    pl.BlockSpec((tn, HW), lambda i: (i, 0)),
                    pl.BlockSpec((1, HW), lambda i: (0, 0)),
                    pl.BlockSpec((1, HW), lambda i: (0, 0))]
        out_cols = HW
        chunk_bytes = cr * HW * 4
        block_bytes = tn * HW * itemsize

    nb = _cdiv(N, tn)

    # 2 streamed inputs x 2 pipeline buffers + chunk-sized temporaries,
    # capped at 60 MiB so it never exceeds v7x's 64 MiB physical VMEM.
    # TODO(synk): single masks > ~1 Mpx f32 need intra-mask (H) chunking to
    # fit v7x; v5e/v6e (128 MiB VMEM) can raise the cap instead.
    vmem_limit = int(min(60 << 20,
                         max(32 << 20,
                             4 * block_bytes + 16 * chunk_bytes + (4 << 20))))

    partials = pl.pallas_call(
        kernel,
        out_shape=jax.ShapeDtypeStruct((nb, out_rows, out_cols), jnp.float32),
        grid=(nb,),
        in_specs=in_specs,
        out_specs=pl.BlockSpec((1, out_rows, out_cols), lambda i: (i, 0, 0)),
        compiler_params=pltpu.CompilerParams(
            dimension_semantics=("parallel",),   # shards across v7x's 2 TCs
            vmem_limit_bytes=vmem_limit,
        ),
    )(*inputs)

    # Global means: per-element weights were applied inside the kernel; the
    # divisor is the global element count (same for mask and boundary terms).
    mask_and_boundary = jnp.sum(partials) / float(N * HW)

    # bbox L1 is only 4*B floats; keep it in plain JAX (no padded (8,128)
    # block DMA'd every grid step for 8 numbers).
    bbox_l1 = jnp.mean(jnp.abs(pred_bbox.astype(jnp.float32)
                               - target_bbox.astype(jnp.float32)))
    return BBOX_W * bbox_l1 + mask_and_boundary


# ---------------------------------------------------------------------------
# Pure-JAX reference + demo
# ---------------------------------------------------------------------------
def _ref_loss(pred_bbox, pred_mask, target_bbox, target_mask):
    """Pure-JAX mirror of the PyTorch forward (sanity check only)."""
    def grads(m):
        gx = jnp.abs(m[:, :, :, 1:] - m[:, :, :, :-1])
        gy = jnp.abs(m[:, :, 1:, :] - m[:, :, :-1, :])
        gx = jnp.pad(gx, ((0, 0), (0, 0), (0, 0), (0, 1)))
        gy = jnp.pad(gy, ((0, 0), (0, 0), (0, 1), (0, 0)))
        return gx + gy

    bbox = jnp.mean(jnp.abs(pred_bbox - target_bbox))
    pm, tm = pred_mask, target_mask
    mask = jnp.mean(-(tm * jnp.maximum(jnp.log(pm), -100.0)
                      + (1.0 - tm) * jnp.maximum(jnp.log(1.0 - pm), -100.0)))
    pg, tg = grads(pm), grads(tm)
    bnd = jnp.mean(jnp.maximum(pg, 0.0) - pg * tg
                   + jnp.log(1.0 + jnp.exp(-jnp.abs(pg))))
    return BBOX_W * bbox + MASK_W * mask + BOUND_W * bnd


def _make_inputs(key, B, C, H, W):
    k1, k2, k3, k4 = jax.random.split(key, 4)
    pred_bbox = jax.nn.sigmoid(jax.random.normal(k1, (B, 4), jnp.float32))
    target_bbox = jax.random.uniform(k2, (B, 4), jnp.float32)
    pred_mask = jax.nn.sigmoid(jax.random.normal(k3, (B, C, H, W), jnp.float32))
    target_mask = jnp.round(jax.random.uniform(k4, (B, C, H, W), jnp.float32))
    return pred_bbox, pred_mask, target_bbox, target_mask


if __name__ == "__main__":
    root = jax.random.PRNGKey(0)
    k_a, k_b, k_c = jax.random.split(root, 3)

    # A) W < 128 -> lane-dense flat path; default sizing gives 2 blocks of 8.
    args = _make_inputs(k_a, 4, 4, 16, 16)
    ref = _ref_loss(*args)
    out = hybrid_loss(*args)
    jax.block_until_ready(out)
    assert jnp.allclose(out, ref, rtol=1e-4, atol=1e-5), (out, ref)

    # B) N % tn != 0 -> tail-row masking + 2 inner chunks per block (fori).
    args = _make_inputs(k_b, 5, 4, 16, 16)
    ref = _ref_loss(*args)
    out = hybrid_loss(*args)
    jax.block_until_ready(out)
    assert jnp.allclose(out, ref, rtol=1e-4, atol=1e-5), (out, ref)

    # C) W >= 128 -> sublane-oriented (N, H, W) path, in-kernel edge masks.
    args = _make_inputs(k_c, 2, 2, 8, 128)
    ref = _ref_loss(*args)
    out = hybrid_loss(*args)
    jax.block_until_ready(out)
    assert jnp.allclose(out, ref, rtol=1e-4, atol=1e-5), (out, ref)

    print("KERNEL_OK")
</pallas_src>

<mosaic_0001>
module attributes {stable_mosaic.version = 11 : i64} {
  func.func @kernel(%arg0: i32, %arg1: memref<8x256xf32, #tpu.memory_space<vmem>>, %arg2: memref<8x256xf32, #tpu.memory_space<vmem>>, %arg3: memref<1x256xf32, #tpu.memory_space<vmem>>, %arg4: memref<1x256xf32, #tpu.memory_space<vmem>>, %arg5: memref<1x8x256xf32, #tpu.memory_space<vmem>>) attributes {dimension_semantics = [#tpu.dimension_semantics<parallel>], iteration_bounds = array<i64: 2>, scalar_prefetch = 0 : i64, scratch_operands = 0 : i64, tpu.core_type = #tpu.core_type<tc>, window_params = [{transform_indices = @transform_0, window_bounds = array<i64: 8, 256>}, {transform_indices = @transform_1, window_bounds = array<i64: 8, 256>}, {pipeline_mode = #tpu.pipeline_mode<synchronous>, transform_indices = @transform_2, window_bounds = array<i64: 1, 256>}, {pipeline_mode = #tpu.pipeline_mode<synchronous>, transform_indices = @transform_3, window_bounds = array<i64: 1, 256>}, {transform_indices = @transform_4, window_bounds = array<i64: 1, 8, 256>}]} {
    %c0 = arith.constant 0 : index
    %c0_0 = arith.constant 0 : index
    %0 = vector.load %arg3[%c0, %c0_0] : memref<1x256xf32, #tpu.memory_space<vmem>>, vector<1x256xf32>
    %c0_1 = arith.constant 0 : index
    %c0_2 = arith.constant 0 : index
    %1 = vector.load %arg4[%c0_1, %c0_2] : memref<1x256xf32, #tpu.memory_space<vmem>>, vector<1x256xf32>
    %cst = arith.constant 0.000000e+00 : f32
    %2 = vector.broadcast %cst : f32 to vector<8x256xf32>
    %c0_3 = arith.constant 0 : index
    %c0_4 = arith.constant 0 : index
    %3 = vector.load %arg1[%c0_3, %c0_4] : memref<8x256xf32, #tpu.memory_space<vmem>>, vector<8x256xf32>
    %c0_5 = arith.constant 0 : index
    %c0_6 = arith.constant 0 : index
    %4 = vector.load %arg2[%c0_5, %c0_6] : memref<8x256xf32, #tpu.memory_space<vmem>>, vector<8x256xf32>
    %5 = math.log %3 : vector<8x256xf32>
    %cst_7 = arith.constant -1.000000e+02 : f32
    %6 = vector.broadcast %cst_7 : f32 to vector<8x256xf32>
    %7 = arith.maximumf %5, %6 : vector<8x256xf32>
    %cst_8 = arith.constant 1.000000e+00 : f32
    %8 = vector.broadcast %cst_8 : f32 to vector<8x256xf32>
    %9 = arith.subf %8, %3 : vector<8x256xf32>
    %10 = math.log %9 : vector<8x256xf32>
    %cst_9 = arith.constant -1.000000e+02 : f32
    %11 = vector.broadcast %cst_9 : f32 to vector<8x256xf32>
    %12 = arith.maximumf %10, %11 : vector<8x256xf32>
    %13 = arith.mulf %4, %7 : vector<8x256xf32>
    %cst_10 = arith.constant 1.000000e+00 : f32
    %14 = vector.broadcast %cst_10 : f32 to vector<8x256xf32>
    %15 = arith.subf %14, %4 : vector<8x256xf32>
    %16 = arith.mulf %15, %12 : vector<8x256xf32>
    %17 = arith.addf %13, %16 : vector<8x256xf32>
    %cst_11 = arith.constant 0.000000e+00 : f32
    %18 = vector.broadcast %cst_11 : f32 to vector<8x256xf32>
    %19 = arith.subf %18, %17 : vector<8x256xf32>
    %20 = vector.extract_strided_slice %3 {offsets = [0, 1], sizes = [8, 255], strides = [1, 1]} : vector<8x256xf32> to vector<8x255xf32>
    %21 = vector.extract_strided_slice %3 {offsets = [0, 0], sizes = [8, 1], strides = [1, 1]} : vector<8x256xf32> to vector<8x1xf32>
    %22 = tpu.concatenate %20, %21 in 1 : vector<8x255xf32>, vector<8x1xf32> -> vector<8x256xf32>
    %23 = arith.subf %22, %3 : vector<8x256xf32>
    %24 = math.absf %23 : vector<8x256xf32>
    %25 = vector.broadcast %0 : vector<1x256xf32> to vector<8x256xf32>
    %26 = arith.mulf %24, %25 : vector<8x256xf32>
    %27 = vector.extract_strided_slice %3 {offsets = [0, 16], sizes = [8, 240], strides = [1, 1]} : vector<8x256xf32> to vector<8x240xf32>
    %28 = vector.extract_strided_slice %3 {offsets = [0, 0], sizes = [8, 16], strides = [1, 1]} : vector<8x256xf32> to vector<8x16xf32>
    %29 = tpu.concatenate %27, %28 in 1 : vector<8x240xf32>, vector<8x16xf32> -> vector<8x256xf32>
    %30 = arith.subf %29, %3 : vector<8x256xf32>
    %31 = math.absf %30 : vector<8x256xf32>
    %32 = vector.broadcast %1 : vector<1x256xf32> to vector<8x256xf32>
    %33 = arith.mulf %31, %32 : vector<8x256xf32>
    %34 = arith.addf %26, %33 : vector<8x256xf32>
    %35 = vector.extract_strided_slice %4 {offsets = [0, 1], sizes = [8, 255], strides = [1, 1]} : vector<8x256xf32> to vector<8x255xf32>
    %36 = vector.extract_strided_slice %4 {offsets = [0, 0], sizes = [8, 1], strides = [1, 1]} : vector<8x256xf32> to vector<8x1xf32>
    %37 = tpu.concatenate %35, %36 in 1 : vector<8x255xf32>, vector<8x1xf32> -> vector<8x256xf32>
    %38 = arith.subf %37, %4 : vector<8x256xf32>
    %39 = math.absf %38 : vector<8x256xf32>
    %40 = vector.broadcast %0 : vector<1x256xf32> to vector<8x256xf32>
    %41 = arith.mulf %39, %40 : vector<8x256xf32>
    %42 = vector.extract_strided_slice %4 {offsets = [0, 16], sizes = [8, 240], strides = [1, 1]} : vector<8x256xf32> to vector<8x240xf32>
    %43 = vector.extract_strided_slice %4 {offsets = [0, 0], sizes = [8, 16], strides = [1, 1]} : vector<8x256xf32> to vector<8x16xf32>
    %44 = tpu.concatenate %42, %43 in 1 : vector<8x240xf32>, vector<8x16xf32> -> vector<8x256xf32>
    %45 = arith.subf %44, %4 : vector<8x256xf32>
    %46 = math.absf %45 : vector<8x256xf32>
    %47 = vector.broadcast %1 : vector<1x256xf32> to vector<8x256xf32>
    %48 = arith.mulf %46, %47 : vector<8x256xf32>
    %49 = arith.addf %41, %48 : vector<8x256xf32>
    %50 = arith.mulf %34, %49 : vector<8x256xf32>
    %51 = arith.subf %34, %50 : vector<8x256xf32>
    %cst_12 = arith.constant 1.000000e+00 : f32
    %52 = vector.broadcast %cst_12 : f32 to vector<8x256xf32>
    %53 = arith.subf %34, %52 : vector<8x256xf32>
    %cst_13 = arith.constant -1.08632332E-6 : f32
    %54 = vector.broadcast %cst_13 : f32 to vector<8x256xf32>
    %55 = arith.mulf %54, %53 : vector<8x256xf32>
    %cst_14 = arith.constant 1.88883325E-6 : f32
    %56 = vector.broadcast %cst_14 : f32 to vector<8x256xf32>
    %57 = arith.addf %55, %56 : vector<8x256xf32>
    %58 = arith.mulf %57, %53 : vector<8x256xf32>
    %cst_15 = arith.constant 1.37258621E-5 : f32
    %59 = vector.broadcast %cst_15 : f32 to vector<8x256xf32>
    %60 = arith.addf %58, %59 : vector<8x256xf32>
    %61 = arith.mulf %60, %53 : vector<8x256xf32>
    %cst_16 = arith.constant -5.63558242E-5 : f32
    %62 = vector.broadcast %cst_16 : f32 to vector<8x256xf32>
    %63 = arith.addf %61, %62 : vector<8x256xf32>
    %64 = arith.mulf %63, %53 : vector<8x256xf32>
    %cst_17 = arith.constant -7.07753424E-5 : f32
    %65 = vector.broadcast %cst_17 : f32 to vector<8x256xf32>
    %66 = arith.addf %64, %65 : vector<8x256xf32>
    %67 = arith.mulf %66, %53 : vector<8x256xf32>
    %cst_18 = arith.constant 0.00102926802 : f32
    %68 = vector.broadcast %cst_18 : f32 to vector<8x256xf32>
    %69 = arith.addf %67, %68 : vector<8x256xf32>
    %70 = arith.mulf %69, %53 : vector<8x256xf32>
    %cst_19 = arith.constant -0.0014719246 : f32
    %71 = vector.broadcast %cst_19 : f32 to vector<8x256xf32>
    %72 = arith.addf %70, %71 : vector<8x256xf32>
    %73 = arith.mulf %72, %53 : vector<8x256xf32>
    %cst_20 = arith.constant -0.0151429651 : f32
    %74 = vector.broadcast %cst_20 : f32 to vector<8x256xf32>
    %75 = arith.addf %73, %74 : vector<8x256xf32>
    %76 = arith.mulf %75, %53 : vector<8x256xf32>
    %cst_21 = arith.constant 0.0983059704 : f32
    %77 = vector.broadcast %cst_21 : f32 to vector<8x256xf32>
    %78 = arith.addf %76, %77 : vector<8x256xf32>
    %79 = arith.mulf %78, %53 : vector<8x256xf32>
    %cst_22 = arith.constant -0.268941432 : f32
    %80 = vector.broadcast %cst_22 : f32 to vector<8x256xf32>
    %81 = arith.addf %79, %80 : vector<8x256xf32>
    %82 = arith.mulf %81, %53 : vector<8x256xf32>
    %cst_23 = arith.constant 0.313261688 : f32
    %83 = vector.broadcast %cst_23 : f32 to vector<8x256xf32>
    %84 = arith.addf %82, %83 : vector<8x256xf32>
    %85 = arith.addf %51, %84 : vector<8x256xf32>
    %cst_24 = arith.constant 4.000000e-01 : f32
    %86 = vector.broadcast %cst_24 : f32 to vector<8x256xf32>
    %87 = arith.mulf %86, %19 : vector<8x256xf32>
    %cst_25 = arith.constant 2.000000e-01 : f32
    %88 = vector.broadcast %cst_25 : f32 to vector<8x256xf32>
    %89 = arith.mulf %88, %85 : vector<8x256xf32>
    %90 = arith.addf %87, %89 : vector<8x256xf32>
    %91 = arith.addf %2, %90 : vector<8x256xf32>
    %92 = vector.shape_cast %91 : vector<8x256xf32> to vector<1x8x256xf32>
    %c0_26 = arith.constant 0 : index
    %c0_27 = arith.constant 0 : index
    %c0_28 = arith.constant 0 : index
    %93 = vector.load %arg5[%c0_26, %c0_27, %c0_28] : memref<1x8x256xf32, #tpu.memory_space<vmem>>, vector<1x8x256xf32>
    tpu.vector_store %arg5[%c0_26, %c0_27, %c0_28], %92 {strides = array<i32>} : memref<1x8x256xf32, #tpu.memory_space<vmem>>, vector<1x8x256xf32>,
    return
  }
  func.func @transform_0(%arg0: i32) -> (i32, i32) {
    %c0_i32 = arith.constant 0 : i32
    %c0_i32_0 = arith.constant 0 : i32
    return %arg0, %c0_i32 : i32, i32
  }
  func.func @transform_1(%arg0: i32) -> (i32, i32) {
    %c0_i32 = arith.constant 0 : i32
    %c0_i32_0 = arith.constant 0 : i32
    return %arg0, %c0_i32 : i32, i32
  }
  func.func @transform_2(%arg0: i32) -> (i32, i32) {
    %c0_i32 = arith.constant 0 : i32
    %c0_i32_0 = arith.constant 0 : i32
    %c0_i32_1 = arith.constant 0 : i32
    return %c0_i32, %c0_i32_0 : i32, i32
  }
  func.func @transform_3(%arg0: i32) -> (i32, i32) {
    %c0_i32 = arith.constant 0 : i32
    %c0_i32_0 = arith.constant 0 : i32
    %c0_i32_1 = arith.constant 0 : i32
    return %c0_i32, %c0_i32_0 : i32, i32
  }
  func.func @transform_4(%arg0: i32) -> (i32, i32, i32) {
    %c0_i32 = arith.constant 0 : i32
    %c0_i32_0 = arith.constant 0 : i32
    %c0_i32_1 = arith.constant 0 : i32
    return %arg0, %c0_i32, %c0_i32_0 : i32, i32, i32
  }
}

</mosaic_0001>

<bundles_post_ra>
// kernel: tpu_custom_call.1
= control target key start
LH: loop header
LB: loop body
LE: loop exit
PB: predicated region body
PF: predicated region fallthrough
CT: control target
= control target key end

     0   :  { %9 = vsyncpa [#allocation3], 0  ;;  %s1088_s0 = inlined_call_operand.hbm [shape: f32[16,256], index: 0, kind: input, shape index: {}]   ;;  %s1089_s1 = inlined_call_operand.hbm [shape: f32[16,256], index: 1, kind: input, shape index: {}]   ;;  %s1090_s2 = inlined_call_operand.vmem [shape: f32[1,256], index: 2, kind: input, shape index: {}]   ;;  %s1091_s3 = inlined_call_operand.vmem [shape: f32[1,256], index: 3, kind: input, shape index: {}]   ;;  %s1092_s4 = inlined_call_operand.hbm [shape: f32[2,8,256], index: 4, kind: output, shape index: {}]  }
   0x1   :  { %11 = vsyncpa [#allocation3 + $0x1], 0 }
   0x2   :  { %12 = vsyncpa [#allocation6], 0 }
   0x3   :  { %14 = vsyncpa [#allocation6 + $0x1], 0 }
   0x4   :  { %15 = vsyncpa [#allocation4], 0 }
   0x5   :  { %17 = vsyncpa [#allocation4 + $0x1], 0  ;;  %s786_s15 = smov 0   ;;  %s788_s16 = smov 0  }
   0x6   :  { %s790_s17 = smov 0   ;;  %s792_s18 = smov 0  }
   0x7 LB: > { %s807_s19 = sadd.s32 4294967295, %s754_s18   ;;  %s540_s20 = sadd.s32 4294967294, %s754_s18   ;;  %s754_s18 = sphi %s792_s18, %s1111_s18   ;;  %s750_s17 = sphi %s790_s17, %s1110_s17   ;;  %s746_s16 = sphi %s788_s16, %s1109_s16   ;;  %s742_s15 = sphi %s786_s15, %s1108_s15  }
   0x8   : > { %s811_s21 = sadd.s32 1, %s754_s18   ;;  %s30_s22 = sadd.s32 1, %s750_s17 }
   0x9   : > { %s27_s23 = ssub.s32 %s754_s18, %s811_s21  ;;  %p37_p0 = scmp.ne.s32.totalorder %s750_s17, %s746_s16 }
   0xa   : > { %p28_p1 = scmp.eq.s32.totalorder %s27_s23, 0  ;;  %p38_p2 = scmp.eq.s32.totalorder %s754_s18, 0 }
   0xb   : > { %p43_p3 = scmp.ne.s32.totalorder %s746_s16, %s742_s15  ;;  %p44_p4 = scmp.eq.s32.totalorder %s807_s19, 0 }
   0xc   : > { %s823_s24 = scalar_select %p28_p1, %s750_s17, %s30_s22  }
   0xd   : > { %p825_p5 = por %p38_p2, %p37_p0  ;;  %p829_p6 = por %p44_p4, %p43_p3 }
   0xe   : > { %p135_p7 = scmp.eq.s32.totalorder %s807_s19, 1  ;;  %p141_p8 = scmp.eq.s32.totalorder %s540_s20, 1 }
   0xf   : > { %s1096_s26 = scalar_select %p829_p6, 1, 0 }
  0x10   : > { %p580_p10 = scmp.lt.s32.totalorder %s754_s18, 2  ;;  %p836_p11 = por %p135_p7, %p37_p0 }
  0x11   : > { %p840_p12 = por %p141_p8, %p43_p3  ;;  %s845_s29 = sand.u32 1, %s750_s17  }
  0x12   : > { %s1097_s27 = scalar_select %p836_p11, 1, 0 }
  0x13   : > { %s1098_s28 = scalar_select %p840_p12, 1, 0 }
  0x14   : > { %s560_s30 = sshll.u32 %s754_s18, 8  ;;  %s543_s5 = sshll.u32 %s845_s29, 4 }
  0x15   : > { %s854_s8 = scalar_lea.hbm %s1088_s0, %s560_s30  ;;  %s171_s9 = scalar_lea.vmem [#allocation2], %s543_s5 }
  0x16   : > { %s179_s10 = sshll.u32 %s171_s9, 4  ;;  %p860_p13 = pnand %p580_p10, %p825_p5  ;;  %s864_s10 = int_to_ptr.vmem [resolvable:$true] %s179_s10 }
  0x17   : > { %s168_s12 = scalar_lea.sflag [#allocation3], %s845_s29  ;;  %s624_s13 = scalar_lea.hbm %s854_s8, 256 }
  0x18   : > { %p625_p2 = scmp.ne.s32.totalorder %s854_s8, %s624_s13  ;;  %p626_p3 = pneg %p860_p13 }
  0x19   : > { %s629_s22 = scalar_lea.hbm %s1088_s0, 512  ;;  %p630_p5 = scmp.lt.u32.totalorder %s854_s8, %s1088_s0 }
  0x1a   : > { %p627_p4 = pnand %p626_p3, %p625_p2  ;;  %p631_p8 = scmp.lt.u32.totalorder %s629_s22, %s624_s13 }
  0x1b   : > { %p633_p9 = scmp.lt.u32.totalorder %s624_s13, %s854_s8 }
  0x1c   : > { %p628_p7 = pneg %p627_p4  ;;  %p632_p10 = por %p631_p8, %p630_p5 }
  0x1e   : > { %p634_p0 = por %p633_p9, %p632_p10 }
  0x20   : > { %p635_p1 = pnand %p634_p0, %p628_p7 }
  0x22   : > { %638 = shalt.err (!%p635_p1)
}
  0x23   : > { %s639_s6 = scalar_lea.vmem %s864_s10, 256  ;;  %s756_s7 = smov [#allocation2]  }
  0x24   : > { %p640_p2 = scmp.ne.s32.totalorder %s864_s10, %s639_s6  ;;  %s644_s9 = sshll.u32 %s756_s7, 4  ;;  %s645_s9 = int_to_ptr.vmem [resolvable:$false] %s644_s9 }
  0x25   : > { %s646_s14 = scalar_lea.vmem %s645_s9, 512  ;;  %p647_p11 = scmp.lt.s32.totalorder %s864_s10, %s645_s9 }
  0x26   : > { %p642_p4 = pnand %p640_p2, %p626_p3  ;;  %p648_p5 = scmp.lt.s32.totalorder %s646_s14, %s639_s6 }
  0x28   : > { %p643_p12 = pneg %p642_p4  ;;  %p649_p8 = por %p648_p5, %p647_p11 }
  0x2a   : > { %p650_p9 = pnand %p649_p8, %p643_p12 }
  0x2c   : > { %653 = shalt.err (!%p650_p9)
}
  0x2d   : > { %572 = dma.hbm_to_vmem [thread:$0]  (!%p860_p13), %s854_s8, 256, %s864_s10, %s168_s12  }
  0x2e   : > { %p1100_p0 = scmp.lt.s32.totalorder %s754_s18, 3  ;;  %p1101_p1 = scmp.ge.s32.totalorder %s754_s18, 1 }
  0x2f   : > { %s907_s23 = scalar_lea.hbm %s1089_s1, %s560_s30  ;;  %s190_s25 = scalar_lea.vmem [#allocation5], %s543_s5 }
  0x30   : > { %p898_p7 = pnand %p1101_p1, %p1100_p0  ;;  %s198_s6 = sshll.u32 %s190_s25, 4  ;;  %s199_s6 = int_to_ptr.vmem [resolvable:$true] %s198_s6 }
  0x31   : > { %s187_s8 = scalar_lea.sflag [#allocation6], %s845_s29  ;;  %s654_s10 = scalar_lea.hbm %s907_s23, 256 }
  0x32   : > { %s1102_s13 = scalar_select %p898_p7, 1, 0 }
  0x33   : > { %p655_p11 = scmp.ne.s32.totalorder %s907_s23, %s654_s10  ;;  %s659_s30 = scalar_lea.hbm %s1089_s1, 512 }
  0x34   : > { %p660_p2 = scmp.lt.u32.totalorder %s907_s23, %s1089_s1  ;;  %p661_p4 = scmp.lt.u32.totalorder %s659_s30, %s654_s10 }
  0x35   : > { %p657_p12 = pnand %p655_p11, %p626_p3  ;;  %p663_p8 = scmp.lt.u32.totalorder %s654_s10, %s907_s23 }
  0x36   : > { %p662_p5 = por %p661_p4, %p660_p2 }
  0x37   : > { %p658_p10 = pneg %p657_p12 }
  0x38   : > { %p664_p9 = por %p663_p8, %p662_p5 }
  0x3a   : > { %p665_p0 = pnand %p664_p9, %p658_p10 }
  0x3c   : > { %668 = shalt.err (!%p665_p0)
}
  0x3d   : > { %s669_s29 = scalar_lea.vmem %s199_s6, 256  ;;  %s757_s5 = smov [#allocation5]  }
  0x3e   : > { %p670_p1 = scmp.ne.s32.totalorder %s199_s6, %s669_s29  ;;  %s674_s20 = sshll.u32 %s757_s5, 4  ;;  %s675_s20 = int_to_ptr.vmem [resolvable:$false] %s674_s20 }
  0x3f   : > { %s676_s22 = scalar_lea.vmem %s675_s20, 512  ;;  %p677_p6 = scmp.lt.s32.totalorder %s199_s6, %s675_s20 }
  0x40   : > { %p672_p11 = pnand %p670_p1, %p626_p3  ;;  %p678_p7 = scmp.lt.s32.totalorder %s676_s22, %s669_s29 }
  0x42   : > { %p673_p12 = pneg %p672_p11  ;;  %p679_p2 = por %p678_p7, %p677_p6 }
  0x44   : > { %p680_p4 = pnand %p679_p2, %p673_p12 }
  0x46   : > { %683 = shalt.err (!%p680_p4)
}
  0x47   : > { %575 = dma.hbm_to_vmem [thread:$0]  (!%p860_p13), %s907_s23, 256, %s199_s6, %s187_s8  }
  0x48   : > { %p1103_p10 = scmp.ne.s32.totalorder %s1102_s13, 0 }
  0x49   : > { %s934_s25 = sand.u32 (!%p1103_p10), 1, %s746_s16   ;;  %p1104_p6 = scmp.ne.s32.totalorder (!%p1103_p10), %s1096_s26, 0 }
  0x4a   : > { %207 = sbr.rel (%p1103_p10) target bundleno = 276 (0x114), region = 36  ;;  %s937_s10 = sshll.u32 (!%p1103_p10), %s934_s25, 4 }
  0x4b   : > { %s210_s12 = scalar_lea.sflag (!%p1103_p10), [#allocation3], %s934_s25  ;;  %s213_s7 = scalar_lea.vmem (!%p1103_p10), [#allocation2], %s937_s10 }
  0x51   : > { %729 = dma.done.wait (%p1104_p6), %s210_s12, 256  }
  0x52   : > { %731 = vsyncadd (%p1104_p6), %s210_s12, 4294967040  ;;  %s219_s11 = scalar_lea.sflag [#allocation6], %s934_s25  ;;  %s222_s13 = scalar_lea.vmem [#allocation5], %s937_s10 }
  0x53   : > { %733 = dma.done.wait (%p1104_p6), %s219_s11, 256  }
  0x54   : > { %735 = vsyncadd (%p1104_p6), %s219_s11, 4294967040  ;;  %v951_v0 = vld [vmem:[%s213_s7] sm:$0xff]  ;;  %s758_s23 = smov 112   ;;  %s759_s6 = smov 127   ;;  %v255_v1 = vld [vmem:[%s213_s7 + $0x8] sm:$0xff]  ;;  %v299_v4 = vlaneseq  ;;  %vm315_vm0 = vcmask 916480  }
  0x55   : > { %311 = vrot.lane.b32.xlu1 %v951_v0, %s758_s23  ;;  %284 = vrot.lane.b32.xlu0 %v951_v0, %s759_s6  ;;  %v955_v2 = vld [vmem:[%s222_s13 + $0x8] sm:$0xff]  ;;  %v957_v3 = vld [vmem:[%s222_s13] sm:$0xff]  ;;  %vm288_vm1 = vcmask 1039360   ;;  %v264_v41 = vsub.f32 1.0, %v951_v0  ;;  %v265_v43 = vsub.f32 1.0, %v255_v1  ;;  %616 = vlog2.f32 %v951_v0  ;;  %s562_s14 = sshll.u32 %s807_s19, 8 }
  0x56   : > { %v300_v5 = vshrl.u32 %v299_v4, 7  ;;  %v253_v10 = vld [vmem:[%s1091_s3] sm:$0x3]  ;;  %618 = vlog2.f32 %v255_v1  ;;  %s251_s29 = scalar_lea.vmem [#allocation7], %s937_s10  ;;  %s1044_s12 = scalar_lea.hbm %s1092_s4, %s562_s14 }
  0x57   : > { %v252_v11 = vld [vmem:[%s1090_s2] sm:$0x3]  ;;  %620 = vlog2.f32 %v264_v41  ;;  %s447_s5 = sshll.u32 %s251_s29, 4  ;;  %s433_s7 = scalar_lea.sflag [#allocation4], %s934_s25  ;;  %s1046_s5 = int_to_ptr.vmem [resolvable:$true] %s447_s5 }
  0x58   : > { %v301_v8 = vsub.s32 0, %v300_v5  ;;  %v305_v9 = vsub.s32 1, %v300_v5  ;;  %622 = vlog2.f32 %v265_v43  ;;  %s684_s11 = scalar_lea.vmem %s1046_s5, 256  ;;  %p1105_p3 = scmp.ne.s32.totalorder %s1097_s27, 0 }
  0x59   : > { %313 = vrot.lane.b32.xlu1 %v255_v1, %s758_s23  ;;  %286 = vrot.lane.b32.xlu0 %v255_v1, %s759_s6  ;;  %p685_p13 = scmp.ne.s32.totalorder %s1046_s5, %s684_s11  ;;  %s760_s19 = smov [#allocation7]  }
  0x5a   : > { %v969_v13 = vrot.slane %v253_v10, %v301_v8  ;;  %v971_v14 = vrot.slane %v253_v10, %v305_v9  ;;  %v973_v16 = vrot.slane %v252_v11, %v301_v8  ;;  %v981_v25 = vrot.slane %v252_v11, %v305_v9  ;;  %s688_s10 = sshll.u32 %s760_s19, 4  ;;  %s689_s10 = int_to_ptr.vmem [resolvable:$false] %s688_s10 }
  0x5b   : > { %p686_p7 = pnand %p685_p13, %p1105_p3  ;;  %s690_s13 = scalar_lea.vmem %s689_s10, 512 }
  0x5c   : > { %p691_p8 = scmp.lt.s32.totalorder %s1046_s5, %s689_s10  ;;  %p692_p9 = scmp.lt.s32.totalorder %s690_s13, %s684_s11 }
  0x5d   : > { %344 = vrot.lane.b32.xlu1 %v955_v2, %s759_s6  ;;  %342 = vrot.lane.b32.xlu0 %v957_v3, %s759_s6  ;;  %p687_p5 = pneg %p686_p7 }
  0x5e   : > { %p693_p0 = por %p692_p9, %p691_p8 }
  0x5f   : > { %v617_v59 = vpop.eup %616 }
  0x60   : > { %v619_v63 = vpop.eup %618  ;;  %p694_p1 = pnand %p693_p0, %p687_p5 }
  0x61   : > { %359 = vrot.lane.b32.xlu1 %v955_v2, %s758_s23  ;;  %357 = vrot.lane.b32.xlu0 %v957_v3, %s758_s23  ;;  %v621_v5 = vpop.eup %620 }
  0xc7   : > { %v312_v6 = vpop.permute.xlu1 %311  ;;  %v285_v7 = vpop.permute.xlu0 %284 }
  0xcb   : > { %v314_v12 = vpop.permute.xlu1 %313  ;;  %v287_v15 = vpop.permute.xlu0 %286 }
  0xcc   : > { %v316_v17 = vsel %vm315_vm0, %v312_v6, %v314_v12  ;;  %v320_v18 = vsel %vm315_vm0, %v314_v12, %v312_v6  ;;  %v289_v19 = vsel %vm288_vm1, %v285_v7, %v287_v15  ;;  %v293_v20 = vsel %vm288_vm1, %v287_v15, %v285_v7  ;;  %v623_v7 = vpop.eup %622 }
  0xcd   : > { %v321_v21 = vsub.f32 %v316_v17, %v951_v0  ;;  %v322_v22 = vsub.f32 %v320_v18, %v255_v1  ;;  %v294_v23 = vsub.f32 %v289_v19, %v951_v0  ;;  %v295_v24 = vsub.f32 %v293_v20, %v255_v1 }
  0xce   : > { %v259_v17 = vmul.f32 0.6931472, %v617_v59  ;;  %v267_v19 = vmul.f32 0.6931472, %v621_v5  ;;  %v261_v20 = vmul.f32 0.6931472, %v619_v63 }
  0xcf   : > { %v323_v26 = vand.u32 2147483647, %v321_v21  ;;  %v324_v27 = vand.u32 2147483647, %v322_v22  ;;  %v296_v28 = vand.u32 2147483647, %v294_v23  ;;  %v345_v46 = vpop.permute.xlu1 %344  ;;  %v343_v47 = vpop.permute.xlu0 %342 }
  0xd0   : > { %v297_v29 = vand.u32 2147483647, %v295_v24  ;;  %v346_v60 = vsel %vm288_vm1, %v343_v47, %v345_v46  ;;  %v350_v0 = vsel %vm288_vm1, %v345_v46, %v343_v47  ;;  %v269_v22 = vmul.f32 0.6931472, %v623_v7 }
  0xd1   : > { %v336_v30 = vmul.f32 %v969_v13, %v323_v26  ;;  %v337_v31 = vmul.f32 %v971_v14, %v324_v27  ;;  %v309_v32 = vmul.f32 %v973_v16, %v296_v28  ;;  %v351_v8 = vsub.f32 %v346_v60, %v957_v3 }
  0xd2   : > { %v310_v33 = vmul.f32 %v981_v25, %v297_v29  ;;  %v352_v11 = vsub.f32 %v350_v0, %v955_v2  ;;  %v271_v41 = vmax.f32 %v269_v22, -100.0 }
  0xd3   : > { %v987_v34 = vadd.f32 %v336_v30, %v309_v32  ;;  %v360_v54 = vpop.permute.xlu1 %359  ;;  %v358_v55 = vpop.permute.xlu0 %357  ;;  %v353_v23 = vand.u32 2147483647, %v351_v8  ;;  %v274_v30 = vsub.f32 1.0, %v957_v3 }
  0xd4   : > { %v989_v35 = vadd.f32 %v337_v31, %v310_v33  ;;  %v361_v61 = vsel %vm315_vm0, %v358_v55, %v360_v54  ;;  %v365_v1 = vsel %vm315_vm0, %v360_v54, %v358_v55  ;;  %v354_v27 = vand.u32 2147483647, %v352_v11 }
  0xd5   : > { %v992_v36 = vadd.f32 -1.0, %v987_v34  ;;  %v366_v9 = vsub.f32 %v361_v61, %v957_v3  ;;  %v367_v12 = vsub.f32 %v365_v1, %v955_v2  ;;  %v262_v31 = vmax.f32 %v259_v17, -100.0 }
  0xd6   : > { %v995_v37 = vadd.f32 -1.0, %v989_v35  ;;  %v270_v33 = vmax.f32 %v267_v19, -100.0 }
  0xd7   : > { %v380_v38 = vmul.f32 -1.0863233e-06, %v992_v36  ;;  %v368_v24 = vand.u32 2147483647, %v366_v9  ;;  %v369_v28 = vand.u32 2147483647, %v367_v12 }
  0xd8   : > { %v381_v39 = vmul.f32 -1.0863233e-06, %v995_v37 }
  0xd9   : > { %v382_v40 = vadd.f32 1.8888333e-06, %v380_v38  ;;  %v263_v38 = vmax.f32 %v261_v20, -100.0  ;;  %v370_v43 = vmul.f32 %v368_v24, %v969_v13  ;;  %v371_v46 = vmul.f32 %v369_v28, %v971_v14 }
  0xda   : > { %v383_v42 = vadd.f32 1.8888333e-06, %v381_v39  ;;  %v275_v39 = vsub.f32 1.0, %v955_v2 }
  0xdb   : > { %v384_v44 = vmul.f32 %v992_v36, %v382_v40 }
  0xdc   : > { %v385_v45 = vmul.f32 %v995_v37, %v383_v42  ;;  %v355_v42 = vmul.f32 %v353_v23, %v973_v16 }
  0xdd   : > { %v386_v48 = vadd.f32 1.3725862e-05, %v384_v44 }
  0xde   : > { %v387_v49 = vadd.f32 1.3725862e-05, %v385_v45  ;;  %v356_v45 = vmul.f32 %v354_v27, %v981_v25  ;;  %v372_v54 = vadd.f32 %v370_v43, %v355_v42 }
  0xdf   : > { %v388_v50 = vmul.f32 %v992_v36, %v386_v48  ;;  %v272_v48 = vmul.f32 %v262_v31, %v957_v3 }
  0xe0   : > { %v389_v51 = vmul.f32 %v995_v37, %v387_v49  ;;  %v373_v55 = vadd.f32 %v371_v46, %v356_v45  ;;  %v374_v3 = vmul.f32 %v372_v54, %v987_v34 }
  0xe1   : > { %v390_v52 = vadd.f32 -5.6355824e-05, %v388_v50  ;;  %v276_v50 = vmul.f32 %v274_v30, %v270_v33 }
  0xe2   : > { %v391_v53 = vadd.f32 -5.6355824e-05, %v389_v51  ;;  %v273_v51 = vmul.f32 %v263_v38, %v955_v2  ;;  %v375_v59 = vmul.f32 %v373_v55, %v989_v35  ;;  %v376_v0 = vsub.f32 %v987_v34, %v374_v3 }
  0xe3   : > { %v392_v56 = vmul.f32 %v992_v36, %v390_v52  ;;  %v278_v25 = vadd.f32 %v276_v50, %v272_v48 }
  0xe4   : > { %v393_v57 = vmul.f32 %v995_v37, %v391_v53  ;;  %v277_v53 = vmul.f32 %v275_v39, %v271_v41 }
  0xe5   : > { %v394_v58 = vadd.f32 -7.077534e-05, %v392_v56  ;;  %v280_v61 = vsub.f32 0.0, %v278_v25 }
  0xe6   : > { %v395_v62 = vadd.f32 -7.077534e-05, %v393_v57  ;;  %v279_v57 = vadd.f32 %v277_v53, %v273_v51 }
  0xe7   : > { %v396_v4 = vmul.f32 %v992_v36, %v394_v58  ;;  %v422_v7 = vmul.f32 0.4, %v280_v61 }
  0xe8   : > { %v397_v6 = vmul.f32 %v995_v37, %v395_v62  ;;  %v281_v63 = vsub.f32 0.0, %v279_v57 }
  0xe9   : > { %v398_v10 = vadd.f32 0.001029268, %v396_v4  ;;  %v377_v4 = vsub.f32 %v989_v35, %v375_v59 }
  0xea   : > { %v399_v15 = vadd.f32 0.001029268, %v397_v6  ;;  %v423_v9 = vmul.f32 0.4, %v281_v63 }
  0xeb   : > { %v400_v18 = vmul.f32 %v992_v36, %v398_v10 }
  0xec   : > { %v401_v21 = vmul.f32 %v995_v37, %v399_v15 }
  0xed   : > { %v402_v26 = vadd.f32 -0.0014719246, %v400_v18 }
  0xee   : > { %v403_v29 = vadd.f32 -0.0014719246, %v401_v21 }
  0xef   : > { %v404_v32 = vmul.f32 %v992_v36, %v402_v26 }
  0xf0   : > { %v405_v40 = vmul.f32 %v995_v37, %v403_v29 }
  0xf1   : > { %v406_v44 = vadd.f32 -0.015142965, %v404_v32 }
  0xf2   : > { %v407_v47 = vadd.f32 -0.015142965, %v405_v40 }
  0xf3   : > { %v408_v49 = vmul.f32 %v992_v36, %v406_v44 }
  0xf4   : > { %v409_v52 = vmul.f32 %v995_v37, %v407_v47 }
  0xf5   : > { %v410_v16 = vadd.f32 0.09830597, %v408_v49 }
  0xf6   : > { %v411_v13 = vadd.f32 0.09830597, %v409_v52 }
  0xf7   : > { %v412_v56 = vmul.f32 %v992_v36, %v410_v16 }
  0xf8   : > { %v413_v14 = vmul.f32 %v995_v37, %v411_v13 }
  0xf9   : > { %v414_v58 = vadd.f32 -0.26894143, %v412_v56 }
  0xfa   : > { %v415_v2 = vadd.f32 -0.26894143, %v413_v14 }
  0xfb   : > { %v416_v60 = vmul.f32 %v992_v36, %v414_v58 }
  0xfc   : > { %v417_v62 = vmul.f32 %v995_v37, %v415_v2 }
  0xfd   : > { %v418_v1 = vadd.f32 0.3132617, %v416_v60 }
  0xfe   : > { %v419_v5 = vadd.f32 0.3132617, %v417_v62 }
  0xff   : > { %v420_v6 = vadd.f32 %v418_v1, %v376_v0 }
 0x100   : > { %v421_v8 = vadd.f32 %v419_v5, %v377_v4 }
 0x101   : > { %v424_v10 = vmul.f32 0.2, %v420_v6 }
 0x102   : > { %v425_v36 = vmul.f32 0.2, %v421_v8 }
 0x103   : > { %v426_v11 = vadd.f32 %v424_v10, %v422_v7 }
 0x104   : > { %v427_v37 = vadd.f32 %v425_v36, %v423_v9 }
 0x105   : > { %430 = vst [vmem:[%s251_s29] sm:$0xff] %v426_v11 }
 0x106   : > { %431 = vst [vmem:[%s251_s29 + $0x8] sm:$0xff] %v427_v37 }
 0x107   : > { %697 = shalt.err (!%p694_p1)
}
 0x108   : > { %s698_s25 = scalar_lea.hbm %s1044_s12, 256  ;;  %s702_s26 = scalar_lea.hbm %s1092_s4, 512 }
 0x109   : > { %p699_p11 = scmp.ne.s32.totalorder %s1044_s12, %s698_s25  ;;  %p703_p4 = scmp.lt.u32.totalorder %s1044_s12, %s1092_s4 }
 0x10a   : > { %p704_p10 = scmp.lt.u32.totalorder %s702_s26, %s698_s25  ;;  %p706_p13 = scmp.lt.u32.totalorder %s698_s25, %s1044_s12 }
 0x10b   : > { %p700_p12 = pnand %p699_p11, %p1105_p3 }
 0x10c   : > { %p705_p6 = por %p704_p10, %p703_p4 }
 0x10d   : > { %p701_p2 = pneg %p700_p12 }
 0x10e   : > { %p707_p7 = por %p706_p13, %p705_p6 }
 0x110   : > { %p708_p5 = pnand %p707_p7, %p701_p2 }
 0x112   : > { %711 = shalt.err (!%p708_p5)
}
 0x113   : > { %567 = dma.vmem_to_hbm [thread:$0]  (%p1105_p3), %s1046_s5, 256, %s1044_s12, %s433_s7  }
 0x114 PF: > { %s459_s9 = sand.u32 1, %s742_s15   ;;  %p1106_p8 = scmp.ne.s32.totalorder %s1098_s28, 0 }
 0x115   : > { %p1107_p9 = scmp.ge.s32.totalorder %s754_s18, 2  ;;  %s460_s14 = scalar_lea.sflag [#allocation4], %s459_s9 }
 0x117   : > { %p577_p0 = pnand %p1107_p9, %p1106_p8 }
 0x119   : > { %737 = dma.done.wait (!%p577_p0), %s460_s14, 256  }
 0x11a   : > { %739 = vsyncadd (!%p577_p0), %s460_s14, 4294967040  ;;  %p20_p1 = scmp.ge.s32.totalorder %s811_s21, 4   ;;  %s1108_s15 = smov %s746_s16 }
 0x11b   : > { %s1109_s16 = smov %s750_s17  ;;  %s1110_s17 = smov %s823_s24 }
 0x11c   : > { %s1111_s18 = smov %s811_s21  ;;  %22 = sbr.rel (!%p20_p1) target bundleno = 7 (0x7), region = 94 }
 0x123   :  { %465 = vsyncpa [#allocation3], 1 }
 0x124   :  { %467 = vsyncpa [#allocation3 + $0x1], 1 }
 0x125   :  { %468 = vsyncpa [#allocation6], 1 }
 0x126   :  { %470 = vsyncpa [#allocation6 + $0x1], 1 }
 0x127   :  { %471 = vsyncpa [#allocation4], 1 }
 0x128   :  { %473 = vsyncpa [#allocation4 + $0x1], 1 }

</bundles_post_ra>
